<compile_context>
chip_gen: v7x
topology: tpu7x:2x2x1
jax: 0.10.0
libtpu: 0.0.40
codegen_flags: <defaults>
</compile_context>

<pallas_src>
import functools
import math

import jax
import jax.numpy as jnp
from jax import lax
from jax.experimental import pallas as pl
from jax.experimental.pallas import tpu as pltpu


_LANE_TILE = 128                  # TPU vreg lane width
_TARGET_TILE_ELEMS = 256 * 1024   # slab elements per grid step (~64K samples @ C=4)
_NUM_CORE_SPLITS = 2              # leading "parallel" axis (v7x: 2 TCs; harmless on 1-TC chips)
_VMEM_LIMIT_BYTES = 32 * 1024 * 1024


def _pow_gamma(d, gamma):
    """(1 - p)**gamma as a multiply chain for small integer gamma (VALU only)."""
    g = float(gamma)
    if g == int(g) and 0 <= int(g) <= 8:
        gi = int(g)
        if gi == 0:
            return jnp.ones_like(d)
        r = d
        for _ in range(gi - 1):
            r = r * d
        return r
    return jnp.power(d, jnp.float32(g))


def _shift_lanes_left(x, k):
    """y[..., l] = x[..., l + k] for l < L - k.

    The k wrapped lanes at the end of each row are never read at group-leader
    lanes (a sample's C lanes never straddle a slab row), so a plain
    rotate-by-concatenation is sufficient and unambiguous.
    """
    if k == 0:
        return x
    return jnp.concatenate([x[:, k:], x[:, :k]], axis=1)


def _focal_loss_kernel(logits_ref, tgt_ref, alpha_ref, out_ref, *,
                       num_classes, gamma, n_elems, tile_rows, lane_w,
                       tiles_per_split):
    # logits_ref: (tile_rows, lane_w) native-dtype slab; the C logits of one
    #             sample sit in C adjacent lanes (natural (N, C) memory order).
    # tgt_ref   : (tile_rows, lane_w) int8, target id replicated over the C
    #             lanes of its sample.
    # alpha_ref : (1, lane_w) f32, alpha[l % C] at lane l.
    # out_ref   : (1, 1, lane_w) f32 resident per-split partial-sum block.
    p = pl.program_id(0)          # core split ("parallel")
    j = pl.program_id(1)          # tile within split ("arbitrary" / reduction)

    @pl.when(j == 0)
    def _init():
        out_ref[...] = jnp.zeros_like(out_ref)

    # Logical (unclamped) tile id.  The index_map clamps the DMA so it always
    # stays inside the slab; validity below uses the logical id, so duplicated
    # / overflow tiles contribute exactly zero.
    tile_id = p * tiles_per_split + j
    base_elem = tile_id * (tile_rows * lane_w)

    row_iota = lax.broadcasted_iota(jnp.int32, (tile_rows, lane_w), 0)
    lane_iota = lax.broadcasted_iota(jnp.int32, (tile_rows, lane_w), 1)
    elem_idx = base_elem + row_iota * lane_w + lane_iota
    valid = elem_idx < n_elems
    leader = (lane_iota % num_classes) == 0    # first lane of each sample group

    # Mask OOB / padded lanes to a finite value *before* max/exp (OOB VMEM data
    # is unspecified and may be NaN/Inf).
    x = jnp.where(valid, logits_ref[...].astype(jnp.float32), 0.0)
    tgt = tgt_ref[...].astype(jnp.int32)
    a_row = alpha_ref[...]                                      # (1, lane_w)

    # xs[c][.., l] == logit of class c of the sample led by lane l (valid at
    # group-leader lanes; other lanes hold cross-group windows that are
    # computed densely and discarded by the `leader` mask below).
    xs = [_shift_lanes_left(x, c) for c in range(num_classes)]
    a_sh = [_shift_lanes_left(a_row, c) for c in range(num_classes)]

    m = xs[0]
    for c in range(1, num_classes):
        m = jnp.maximum(m, xs[c])
    sum_exp = jnp.exp(xs[0] - m)
    for c in range(1, num_classes):
        sum_exp = sum_exp + jnp.exp(xs[c] - m)
    lse = m + jnp.log(sum_exp)                 # logsumexp over the C classes

    # Gather the target-class logit / alpha with a short select chain.
    x_t = xs[num_classes - 1]
    alpha_t = jnp.zeros_like(x) + a_sh[num_classes - 1]
    for c in range(num_classes - 2, -1, -1):
        hit = tgt == c
        x_t = jnp.where(hit, xs[c], x_t)
        alpha_t = jnp.where(hit, a_sh[c], alpha_t)

    log_p = x_t - lse                          # log softmax of the target class
    probs = jnp.exp(log_p)
    loss = -alpha_t * _pow_gamma(1.0 - probs, gamma) * log_p
    contrib = jnp.where(jnp.logical_and(leader, valid), loss, 0.0)

    # Per-step: sublane reduce + VALU add into the resident lane-dense partials;
    # the single cross-lane reduction happens once, in the wrapper.
    out_ref[...] += jnp.sum(contrib, axis=0, keepdims=True)[None]


def _reference_focal_loss(logits, targets, alpha, gamma=2, size_average=True):
    """Pure-JAX mirror of the PyTorch FocalLoss.forward."""
    p = jax.nn.softmax(logits.astype(jnp.float32), axis=1)
    n, c = logits.shape
    mask = jax.nn.one_hot(targets.reshape(-1), c, dtype=jnp.float32)
    probs = jnp.sum(p * mask, axis=1, keepdims=True)
    alpha_n = jnp.asarray(alpha, jnp.float32).reshape(-1)[targets.reshape(-1)]
    alpha_n = alpha_n.reshape(-1, 1)
    log_p = jnp.log(probs)
    batch_loss = -alpha_n * jnp.power(1.0 - probs, float(gamma)) * log_p
    return jnp.mean(batch_loss) if size_average else jnp.sum(batch_loss)


def focal_loss(logits, targets, alpha=None, *, gamma=2, size_average=True):
    """Pallas TPU focal loss (forward).

    logits : (N, C) float array (any float dtype; upcast to f32 in-kernel)
    targets: (N,)   integer class ids in [0, C)
    alpha  : (C, 1) per-class weights (defaults to ones, as in the module)
    """
    n, c = logits.shape
    targets = targets.reshape(-1)
    if alpha is None:
        alpha = jnp.ones((c, 1), dtype=jnp.float32)
    alpha_flat = jnp.asarray(alpha, dtype=jnp.float32).reshape(-1)

    if c > 16:
        # TODO(synk): wide classifiers need a class-tiled kernel; the fully
        # unrolled per-class shift/select chain only makes sense for small C.
        return _reference_focal_loss(logits, targets, alpha, gamma, size_average)

    # Lane width: smallest multiple of 128 lanes that holds whole samples, so a
    # sample's C logits never straddle a slab row.
    lane_w = (_LANE_TILE * c) // math.gcd(_LANE_TILE, c)

    # Zero-copy flat views of the natural, contiguous (N, C) buffer; targets
    # are replicated to the same layout as cheap int8 (4 B/sample for C=4).
    flat_logits = logits.reshape(-1)
    flat_tgt = jnp.broadcast_to(targets.astype(jnp.int8)[:, None],
                                (n, c)).reshape(-1)

    n_elems = n * c
    rem = (-n_elems) % lane_w
    if rem:   # ragged batch: pad the flat views by at most one slab row.
        flat_logits = jnp.pad(flat_logits, (0, rem))
        flat_tgt = jnp.pad(flat_tgt, (0, rem))
    rows = (n_elems + rem) // lane_w

    logits_slab = flat_logits.reshape(rows, lane_w)
    tgt_slab = flat_tgt.reshape(rows, lane_w)
    # alpha broadcast so that alpha_row[0, l] == alpha[l % C].
    alpha_row = jnp.tile(alpha_flat, lane_w // c).reshape(1, lane_w)

    # ~64K samples per grid step (C=4 -> 2048 x 128 rows, ~1.25 MiB of input):
    # big enough to amortize per-step overhead, small enough that the
    # double-buffered inputs plus in-kernel temporaries fit comfortably in the
    # 32 MiB scoped-VMEM budget on every generation (v7x: 64 MiB physical).
    tile_rows = min(rows, max(32, _TARGET_TILE_ELEMS // lane_w))
    if tile_rows != rows:
        tile_rows = max(32, (tile_rows // 32) * 32)   # packing-friendly sublanes

    tiles_total = pl.cdiv(rows, tile_rows)
    tiles_per_split = pl.cdiv(tiles_total, _NUM_CORE_SPLITS)

    def data_map(p, j):
        t = p * tiles_per_split + j
        # Clamp keeps the DMA inside the slab; overflow/duplicated tiles are
        # zeroed in-kernel via the validity mask (computed from the unclamped
        # logical tile index).
        return (jnp.minimum(t, tiles_total - 1), 0)

    kernel = functools.partial(
        _focal_loss_kernel,
        num_classes=c,
        gamma=float(gamma),
        n_elems=n_elems,
        tile_rows=tile_rows,
        lane_w=lane_w,
        tiles_per_split=tiles_per_split,
    )

    partials = pl.pallas_call(
        kernel,
        out_shape=jax.ShapeDtypeStruct((_NUM_CORE_SPLITS, 1, lane_w),
                                       jnp.float32),
        grid_spec=pltpu.PrefetchScalarGridSpec(
            num_scalar_prefetch=0,
            grid=(_NUM_CORE_SPLITS, tiles_per_split),
            in_specs=[
                pl.BlockSpec((tile_rows, lane_w), data_map),      # logits slab
                pl.BlockSpec((tile_rows, lane_w), data_map),      # targets slab
                pl.BlockSpec((1, lane_w), lambda p, j: (0, 0)),   # alpha row
            ],
            out_specs=pl.BlockSpec((1, 1, lane_w), lambda p, j: (p, 0, 0)),
        ),
        compiler_params=pltpu.CompilerParams(
            dimension_semantics=("parallel", "arbitrary"),
            vmem_limit_bytes=_VMEM_LIMIT_BYTES,
        ),
    )(logits_slab, tgt_slab, alpha_row)

    total = jnp.sum(partials)
    if size_average:
        return total / jnp.float32(n)
    return total


if __name__ == "__main__":
    key = jax.random.PRNGKey(0)
    k1, k2, k3, k4 = jax.random.split(key, 4)

    # Small shapes consistent with the module (QR-code classifier, class_num=4).
    N, C = 256, 4
    logits = jax.random.normal(k1, (N, C), dtype=jnp.float32)
    targets = jax.random.randint(k2, (N,), 0, C, dtype=jnp.int32)
    alpha = jnp.ones((C, 1), dtype=jnp.float32)               # module default

    loss = jax.block_until_ready(
        focal_loss(logits, targets, alpha, gamma=2, size_average=True))
    ref = _reference_focal_loss(logits, targets, alpha, gamma=2,
                                size_average=True)
    assert jnp.allclose(loss, ref, rtol=1e-4, atol=1e-5), (loss, ref)

    # Ragged batch + non-uniform alpha + sum reduction exercises the in-kernel
    # tail masking, the target/alpha gathers and the size_average=False path.
    N2 = 300
    logits2 = jax.random.normal(k3, (N2, C), dtype=jnp.float32) * 3.0
    targets2 = jax.random.randint(k4, (N2,), 0, C, dtype=jnp.int32)
    alpha2 = jnp.array([[0.5], [1.0], [2.0], [0.25]], dtype=jnp.float32)

    loss2 = jax.block_until_ready(
        focal_loss(logits2, targets2, alpha2, gamma=2, size_average=False))
    ref2 = _reference_focal_loss(logits2, targets2, alpha2, gamma=2,
                                 size_average=False)
    assert jnp.allclose(loss2, ref2, rtol=1e-4, atol=1e-4), (loss2, ref2)

    print("KERNEL_OK")
</pallas_src>

<mosaic_0001>
module attributes {stable_mosaic.version = 11 : i64} {
  func.func @_focal_loss_kernel(%arg0: i32, %arg1: i32, %arg2: memref<8x128xf32, #tpu.memory_space<vmem>>, %arg3: memref<8x128xi8, #tpu.memory_space<vmem>>, %arg4: memref<1x128xf32, #tpu.memory_space<vmem>>, %arg5: memref<1x1x128xf32, #tpu.memory_space<vmem>>) attributes {dimension_semantics = [#tpu.dimension_semantics<parallel>, #tpu.dimension_semantics<arbitrary>], iteration_bounds = array<i64: 2, 1>, scalar_prefetch = 0 : i64, scratch_operands = 0 : i64, tpu.core_type = #tpu.core_type<tc>, window_params = [{transform_indices = @transform_0, window_bounds = array<i64: 8, 128>}, {transform_indices = @transform_1, window_bounds = array<i64: 8, 128>}, {pipeline_mode = #tpu.pipeline_mode<synchronous>, transform_indices = @transform_2, window_bounds = array<i64: 1, 128>}, {transform_indices = @transform_3, window_bounds = array<i64: 1, 1, 128>}]} {
    %c0_i32 = arith.constant 0 : i32
    %0 = arith.cmpi eq, %arg1, %c0_i32 : i32
    %1 = arith.extui %0 : i1 to i32
    %c0_i32_0 = arith.constant 0 : i32
    %2 = arith.cmpi ne, %1, %c0_i32_0 : i32
    scf.if %2 {
      %cst_26 = arith.constant 0.000000e+00 : f32
      %112 = vector.broadcast %cst_26 : f32 to vector<1x1x128xf32>
      %c0_27 = arith.constant 0 : index
      %c0_28 = arith.constant 0 : index
      %c0_29 = arith.constant 0 : index
      %113 = vector.load %arg5[%c0_27, %c0_28, %c0_29] : memref<1x1x128xf32, #tpu.memory_space<vmem>>, vector<1x1x128xf32>
      tpu.vector_store %arg5[%c0_27, %c0_28, %c0_29], %112 {strides = array<i32>} : memref<1x1x128xf32, #tpu.memory_space<vmem>>, vector<1x1x128xf32>,
    } else {
    }
    %c1_i32 = arith.constant 1 : i32
    %3 = arith.muli %arg0, %c1_i32 : i32
    %4 = arith.addi %3, %arg1 : i32
    %c1024_i32 = arith.constant 1024 : i32
    %5 = arith.muli %4, %c1024_i32 : i32
    %6 = tpu.iota {dimensions = array<i32: 0>} : vector<8x128xi32>
    %7 = tpu.iota {dimensions = array<i32: 1>} : vector<8x128xi32>
    %c128_i32 = arith.constant 128 : i32
    %8 = vector.broadcast %c128_i32 : i32 to vector<8x128xi32>
    %9 = arith.muli %6, %8 : vector<8x128xi32>
    %10 = vector.broadcast %5 : i32 to vector<8x128xi32>
    %11 = arith.addi %10, %9 : vector<8x128xi32>
    %12 = arith.addi %11, %7 : vector<8x128xi32>
    %c1024_i32_1 = arith.constant 1024 : i32
    %13 = vector.broadcast %c1024_i32_1 : i32 to vector<8x128xi32>
    %14 = arith.cmpi slt, %12, %13 : vector<8x128xi32>
    %c4_i32 = arith.constant 4 : i32
    %c0_i32_2 = arith.constant 0 : i32
    %15 = arith.cmpi eq, %c4_i32, %c0_i32_2 : i32
    %c1_i32_3 = arith.constant 1 : i32
    %16 = arith.select %15, %c1_i32_3, %c4_i32 : i32
    %17 = vector.broadcast %16 : i32 to vector<8x128xi32>
    %18 = arith.remsi %7, %17 : vector<8x128xi32>
    %c0_i32_4 = arith.constant 0 : i32
    %19 = vector.broadcast %c0_i32_4 : i32 to vector<8x128xi32>
    %20 = arith.cmpi ne, %18, %19 : vector<8x128xi32>
    %c0_i32_5 = arith.constant 0 : i32
    %21 = vector.broadcast %c0_i32_5 : i32 to vector<8x128xi32>
    %22 = arith.cmpi slt, %18, %21 : vector<8x128xi32>
    %c0_i32_6 = arith.constant 0 : i32
    %23 = arith.cmpi slt, %16, %c0_i32_6 : i32
    %24 = vector.broadcast %23 : i1 to vector<8x128xi1>
    %25 = vector.broadcast %24 : vector<8x128xi1> to vector<8x128xi1>
    %26 = arith.xori %22, %25 : vector<8x128xi1>
    %27 = arith.andi %26, %20 : vector<8x128xi1>
    %28 = vector.broadcast %16 : i32 to vector<8x128xi32>
    %29 = arith.addi %18, %28 : vector<8x128xi32>
    %30 = arith.select %27, %29, %18 : vector<8x128xi1>, vector<8x128xi32>
    %c0_i32_7 = arith.constant 0 : i32
    %31 = vector.broadcast %c0_i32_7 : i32 to vector<8x128xi32>
    %32 = arith.cmpi eq, %30, %31 : vector<8x128xi32>
    %c0 = arith.constant 0 : index
    %c0_8 = arith.constant 0 : index
    %33 = vector.load %arg2[%c0, %c0_8] : memref<8x128xf32, #tpu.memory_space<vmem>>, vector<8x128xf32>
    %cst = arith.constant 0.000000e+00 : f32
    %34 = vector.broadcast %cst : f32 to vector<8x128xf32>
    %35 = arith.select %14, %33, %34 : vector<8x128xi1>, vector<8x128xf32>
    %c0_9 = arith.constant 0 : index
    %c0_10 = arith.constant 0 : index
    %36 = vector.load %arg3[%c0_9, %c0_10] : memref<8x128xi8, #tpu.memory_space<vmem>>, vector<8x128xi8>
    %37 = arith.extsi %36 : vector<8x128xi8> to vector<8x128xi32>
    %c0_11 = arith.constant 0 : index
    %c0_12 = arith.constant 0 : index
    %38 = vector.load %arg4[%c0_11, %c0_12] : memref<1x128xf32, #tpu.memory_space<vmem>>, vector<1x128xf32>
    %39 = vector.extract_strided_slice %35 {offsets = [0, 1], sizes = [8, 127], strides = [1, 1]} : vector<8x128xf32> to vector<8x127xf32>
    %40 = vector.extract_strided_slice %35 {offsets = [0, 0], sizes = [8, 1], strides = [1, 1]} : vector<8x128xf32> to vector<8x1xf32>
    %41 = tpu.concatenate %39, %40 in 1 : vector<8x127xf32>, vector<8x1xf32> -> vector<8x128xf32>
    %42 = vector.extract_strided_slice %35 {offsets = [0, 2], sizes = [8, 126], strides = [1, 1]} : vector<8x128xf32> to vector<8x126xf32>
    %43 = vector.extract_strided_slice %35 {offsets = [0, 0], sizes = [8, 2], strides = [1, 1]} : vector<8x128xf32> to vector<8x2xf32>
    %44 = tpu.concatenate %42, %43 in 1 : vector<8x126xf32>, vector<8x2xf32> -> vector<8x128xf32>
    %45 = vector.extract_strided_slice %35 {offsets = [0, 3], sizes = [8, 125], strides = [1, 1]} : vector<8x128xf32> to vector<8x125xf32>
    %46 = vector.extract_strided_slice %35 {offsets = [0, 0], sizes = [8, 3], strides = [1, 1]} : vector<8x128xf32> to vector<8x3xf32>
    %47 = tpu.concatenate %45, %46 in 1 : vector<8x125xf32>, vector<8x3xf32> -> vector<8x128xf32>
    %48 = vector.extract_strided_slice %38 {offsets = [0, 1], sizes = [1, 127], strides = [1, 1]} : vector<1x128xf32> to vector<1x127xf32>
    %49 = vector.extract_strided_slice %38 {offsets = [0, 0], sizes = [1, 1], strides = [1, 1]} : vector<1x128xf32> to vector<1x1xf32>
    %50 = tpu.concatenate %48, %49 in 1 : vector<1x127xf32>, vector<1x1xf32> -> vector<1x128xf32>
    %51 = vector.extract_strided_slice %38 {offsets = [0, 2], sizes = [1, 126], strides = [1, 1]} : vector<1x128xf32> to vector<1x126xf32>
    %52 = vector.extract_strided_slice %38 {offsets = [0, 0], sizes = [1, 2], strides = [1, 1]} : vector<1x128xf32> to vector<1x2xf32>
    %53 = tpu.concatenate %51, %52 in 1 : vector<1x126xf32>, vector<1x2xf32> -> vector<1x128xf32>
    %54 = vector.extract_strided_slice %38 {offsets = [0, 3], sizes = [1, 125], strides = [1, 1]} : vector<1x128xf32> to vector<1x125xf32>
    %55 = vector.extract_strided_slice %38 {offsets = [0, 0], sizes = [1, 3], strides = [1, 1]} : vector<1x128xf32> to vector<1x3xf32>
    %56 = tpu.concatenate %54, %55 in 1 : vector<1x125xf32>, vector<1x3xf32> -> vector<1x128xf32>
    %57 = arith.maximumf %35, %41 : vector<8x128xf32>
    %58 = arith.maximumf %57, %44 : vector<8x128xf32>
    %59 = arith.maximumf %58, %47 : vector<8x128xf32>
    %60 = arith.subf %35, %59 : vector<8x128xf32>
    %61 = math.exp %60 : vector<8x128xf32>
    %62 = arith.subf %41, %59 : vector<8x128xf32>
    %63 = math.exp %62 : vector<8x128xf32>
    %64 = arith.addf %61, %63 : vector<8x128xf32>
    %65 = arith.subf %44, %59 : vector<8x128xf32>
    %66 = math.exp %65 : vector<8x128xf32>
    %67 = arith.addf %64, %66 : vector<8x128xf32>
    %68 = arith.subf %47, %59 : vector<8x128xf32>
    %69 = math.exp %68 : vector<8x128xf32>
    %70 = arith.addf %67, %69 : vector<8x128xf32>
    %71 = math.log %70 : vector<8x128xf32>
    %72 = arith.addf %59, %71 : vector<8x128xf32>
    %cst_13 = arith.constant 0.000000e+00 : f32
    %73 = vector.broadcast %cst_13 : f32 to vector<8x128xf32>
    %74 = vector.broadcast %56 : vector<1x128xf32> to vector<8x128xf32>
    %75 = arith.addf %73, %74 : vector<8x128xf32>
    %c2_i32 = arith.constant 2 : i32
    %76 = vector.broadcast %c2_i32 : i32 to vector<8x128xi32>
    %77 = arith.cmpi eq, %37, %76 : vector<8x128xi32>
    %78 = arith.select %77, %44, %47 : vector<8x128xi1>, vector<8x128xf32>
    %79 = vector.shape_cast %53 : vector<1x128xf32> to vector<1x128xf32>
    %80 = vector.broadcast %79 : vector<1x128xf32> to vector<8x128xf32>
    %81 = arith.select %77, %80, %75 : vector<8x128xi1>, vector<8x128xf32>
    %c1_i32_14 = arith.constant 1 : i32
    %82 = vector.broadcast %c1_i32_14 : i32 to vector<8x128xi32>
    %83 = arith.cmpi eq, %37, %82 : vector<8x128xi32>
    %84 = arith.select %83, %41, %78 : vector<8x128xi1>, vector<8x128xf32>
    %85 = vector.shape_cast %50 : vector<1x128xf32> to vector<1x128xf32>
    %86 = vector.broadcast %85 : vector<1x128xf32> to vector<8x128xf32>
    %87 = arith.select %83, %86, %81 : vector<8x128xi1>, vector<8x128xf32>
    %c0_i32_15 = arith.constant 0 : i32
    %88 = vector.broadcast %c0_i32_15 : i32 to vector<8x128xi32>
    %89 = arith.cmpi eq, %37, %88 : vector<8x128xi32>
    %90 = arith.select %89, %35, %84 : vector<8x128xi1>, vector<8x128xf32>
    %91 = vector.shape_cast %38 : vector<1x128xf32> to vector<1x128xf32>
    %92 = vector.broadcast %91 : vector<1x128xf32> to vector<8x128xf32>
    %93 = arith.select %89, %92, %87 : vector<8x128xi1>, vector<8x128xf32>
    %94 = arith.subf %90, %72 : vector<8x128xf32>
    %95 = math.exp %94 : vector<8x128xf32>
    %cst_16 = arith.constant 0.000000e+00 : f32
    %96 = vector.broadcast %cst_16 : f32 to vector<8x128xf32>
    %97 = arith.subf %96, %93 : vector<8x128xf32>
    %cst_17 = arith.constant 1.000000e+00 : f32
    %98 = vector.broadcast %cst_17 : f32 to vector<8x128xf32>
    %99 = arith.subf %98, %95 : vector<8x128xf32>
    %100 = arith.mulf %99, %99 : vector<8x128xf32>
    %101 = arith.mulf %97, %100 : vector<8x128xf32>
    %102 = arith.mulf %101, %94 : vector<8x128xf32>
    %103 = arith.andi %32, %14 : vector<8x128xi1>
    %cst_18 = arith.constant 0.000000e+00 : f32
    %104 = vector.broadcast %cst_18 : f32 to vector<8x128xf32>
    %105 = arith.select %103, %102, %104 : vector<8x128xi1>, vector<8x128xf32>
    %c0_19 = arith.constant 0 : index
    %c0_20 = arith.constant 0 : index
    %c0_21 = arith.constant 0 : index
    %106 = vector.load %arg5[%c0_19, %c0_20, %c0_21] : memref<1x1x128xf32, #tpu.memory_space<vmem>>, vector<1x1x128xf32>
    %cst_22 = arith.constant dense<0.000000e+00> : vector<128xf32>
    %107 = vector.multi_reduction <add>, %105, %cst_22 [0] : vector<8x128xf32> to vector<128xf32>
    %108 = vector.shape_cast %107 : vector<128xf32> to vector<1x128xf32>
    %109 = vector.shape_cast %108 : vector<1x128xf32> to vector<1x1x128xf32>
    %110 = arith.addf %106, %109 : vector<1x1x128xf32>
    %c0_23 = arith.constant 0 : index
    %c0_24 = arith.constant 0 : index
    %c0_25 = arith.constant 0 : index
    %111 = vector.load %arg5[%c0_23, %c0_24, %c0_25] : memref<1x1x128xf32, #tpu.memory_space<vmem>>, vector<1x1x128xf32>
    tpu.vector_store %arg5[%c0_23, %c0_24, %c0_25], %110 {strides = array<i32>} : memref<1x1x128xf32, #tpu.memory_space<vmem>>, vector<1x1x128xf32>,
    return
  }
  func.func @transform_0(%arg0: i32, %arg1: i32) -> (i32, i32) {
    %c1_i32 = arith.constant 1 : i32
    %0 = arith.muli %arg0, %c1_i32 : i32
    %1 = arith.addi %0, %arg1 : i32
    %c0_i32 = arith.constant 0 : i32
    %2 = arith.minsi %1, %c0_i32 : i32
    %c0_i32_0 = arith.constant 0 : i32
    %c0_i32_1 = arith.constant 0 : i32
    return %2, %c0_i32_0 : i32, i32
  }
  func.func @transform_1(%arg0: i32, %arg1: i32) -> (i32, i32) {
    %c1_i32 = arith.constant 1 : i32
    %0 = arith.muli %arg0, %c1_i32 : i32
    %1 = arith.addi %0, %arg1 : i32
    %c0_i32 = arith.constant 0 : i32
    %2 = arith.minsi %1, %c0_i32 : i32
    %c0_i32_0 = arith.constant 0 : i32
    %c0_i32_1 = arith.constant 0 : i32
    return %2, %c0_i32_0 : i32, i32
  }
  func.func @transform_2(%arg0: i32, %arg1: i32) -> (i32, i32) {
    %c0_i32 = arith.constant 0 : i32
    %c0_i32_0 = arith.constant 0 : i32
    %c0_i32_1 = arith.constant 0 : i32
    return %c0_i32, %c0_i32_0 : i32, i32
  }
  func.func @transform_3(%arg0: i32, %arg1: i32) -> (i32, i32, i32) {
    %c0_i32 = arith.constant 0 : i32
    %c0_i32_0 = arith.constant 0 : i32
    %c0_i32_1 = arith.constant 0 : i32
    return %arg0, %c0_i32, %c0_i32_0 : i32, i32, i32
  }
}

</mosaic_0001>

<bundles_post_ra>
// kernel: tpu_custom_call.1
= control target key start
LH: loop header
LB: loop body
LE: loop exit
PB: predicated region body
PF: predicated region fallthrough
CT: control target
= control target key end

     0   :  { %8 = vsyncpa [#allocation3], 0  ;;  %s953_s0 = inlined_call_operand.hbm [shape: f32[8,128], index: 0, kind: input, shape index: {}]   ;;  %s954_s1 = inlined_call_operand.vmem [shape: s8[8,128], index: 1, kind: input, shape index: {}]   ;;  %s955_s2 = inlined_call_operand.vmem [shape: f32[1,128], index: 2, kind: input, shape index: {}]   ;;  %s956_s3 = inlined_call_operand.hbm [shape: f32[2,1,128], index: 3, kind: output, shape index: {}]  }
   0x1   :  { %10 = vsyncpa [#allocation3 + $0x1], 0 }
   0x2   :  { %11 = vsyncpa [#allocation4], 0 }
   0x3   :  { %13 = vsyncpa [#allocation4 + $0x1], 0  ;;  %s747_s12 = smov 0   ;;  %s749_s13 = smov 0  }
   0x4   :  { %s751_s14 = smov 0   ;;  %s753_s15 = smov 0  }
   0x5   :  { %s755_s16 = smov 0   ;;  %s757_s17 = smov 0  }
   0x6   :  { %s759_s18 = smov 0   ;;  %s761_s19 = smov 0  }
   0x7 LB: > { %s467_s20 = sadd.s32 4294967295, %s719_s19   ;;  %s468_s21 = sadd.s32 4294967294, %s719_s19   ;;  %s719_s19 = sphi %s761_s19, %s19_s19   ;;  %s715_s18 = sphi %s759_s18, %s979_s18   ;;  %s711_s17 = sphi %s757_s17, %s978_s17   ;;  %s707_s16 = sphi %s755_s16, %s943_s16   ;;  %s703_s15 = sphi %s753_s15, %s977_s15   ;;  %s699_s14 = sphi %s751_s14, %s976_s14   ;;  %s695_s13 = sphi %s749_s13, %s975_s13   ;;  %s691_s12 = sphi %s747_s12, %s974_s12  }
   0x8   : > { %s31_s22 = sadd.s32 1, %s715_s18  ;;  %p688_p1 = scmp.ne.s32.totalorder %s707_s16, 0 }
   0x9   : > { %p33_p0 = scmp.ge.s32.totalorder %s31_s22, 2  ;;  %p52_p2 = scmp.eq.s32.totalorder %s719_s19, 0 }
   0xa   : > { %p57_p3 = scmp.ne.s32.totalorder %s707_s16, %s703_s15  ;;  %p58_p5 = scmp.eq.s32.totalorder %s467_s20, 0 }
   0xb   : > { %s981_s22 = smov (%p33_p0, %s31_s22), 0  ;;  %p793_p4 = por %p688_p1, %p52_p2 }
   0xc   : > { %p797_p6 = por %p58_p5, %p57_p3  ;;  %s120_s25 = ssub.s32 %s715_s18, %s981_s22 }
   0xd   : > { %p121_p7 = scmp.eq.s32.totalorder %s120_s25, 0  ;;  %s123_s26 = sadd.s32 1, %s699_s14 }
   0xe   : > { %s961_s24 = scalar_select %p797_p6, 1, 0 }
   0xf   : > { %s805_s27 = scalar_select %p121_p7, %s699_s14, %s123_s26  }
  0x10   : > { %p133_p8 = scmp.ne.s32.totalorder %s699_s14, %s695_s13  ;;  %p134_p9 = scmp.eq.s32.totalorder %s467_s20, 1 }
  0x11   : > { %p139_p10 = scmp.ne.s32.totalorder %s695_s13, %s691_s12  ;;  %p140_p11 = scmp.eq.s32.totalorder %s468_s21, 1 }
  0x12   : > { %p811_p12 = por %p134_p9, %p133_p8  ;;  %p496_p1 = scmp.lt.s32.totalorder %s719_s19, 2 }
  0x13   : > { %p816_p0 = por %p140_p11, %p139_p10  ;;  %s721_s30 = smov [#allocation2]  }
  0x14   : > { %s962_s28 = scalar_select %p811_p12, 1, 0 }
  0x15   : > { %s963_s29 = scalar_select %p816_p0, 1, 0 }
  0x16   : > { %s177_s4 = sshll.u32 %s721_s30, 4  ;;  %p823_p2 = pnand %p496_p1, %p793_p4  ;;  %s178_s4 = int_to_ptr.vmem [resolvable:$true] %s177_s4 }
  0x17   : > { %s586_s8 = scalar_lea.hbm %s953_s0, 128 }
  0x18   : > { %s964_s5 = scalar_select %p823_p2, 1, 0 }
  0x19   : > { %p587_p7 = scmp.ne.s32.totalorder %s953_s0, %s586_s8  ;;  %p588_p8 = pneg %p823_p2 }
  0x1a   : > { %p593_p4 = scmp.lt.u32.totalorder %s586_s8, %s586_s8  ;;  %p595_p11 = scmp.lt.u32.totalorder %s586_s8, %s953_s0 }
  0x1b   : > { %p589_p9 = pnand %p588_p8, %p587_p7 }
  0x1c   : > { %p596_p1 = por %p595_p11, %p593_p4 }
  0x1d   : > { %p590_p10 = pneg %p589_p9 }
  0x1f   : > { %p597_p13 = pnand %p596_p1, %p590_p10 }
  0x21   : > { %600 = shalt.err (!%p597_p13)
}
  0x22   : > { %s601_s20 = scalar_lea.vmem %s178_s4, 128  ;;  %s608_s21 = scalar_lea.vmem %s178_s4, 256 }
  0x23   : > { %p602_p3 = scmp.ne.s32.totalorder %s178_s4, %s601_s20  ;;  %p609_p12 = scmp.lt.s32.totalorder %s178_s4, %s178_s4 }
  0x24   : > { %p610_p6 = scmp.lt.s32.totalorder %s608_s21, %s601_s20 }
  0x25   : > { %p604_p5 = pnand %p602_p3, %p588_p8 }
  0x26   : > { %p611_p2 = por %p610_p6, %p609_p12 }
  0x27   : > { %p605_p0 = pneg %p604_p5 }
  0x29   : > { %p612_p7 = pnand %p611_p2, %p605_p0 }
  0x2b   : > { %615 = shalt.err (!%p612_p7)
}
  0x2c   : > { %p965_p9 = scmp.ne.s32.totalorder %s964_s5, 0  ;;  %p966_p10 = scmp.lt.s32.totalorder %s719_s19, 3 }
  0x2d   : > { %p967_p13 = scmp.ge.s32.totalorder %s719_s19, 1 }
  0x2e   : > { %491 = dma.hbm_to_vmem [thread:$0]  (!%p965_p9), %s953_s0, 128, %s178_s4, [#allocation3]  }
  0x2f   : > { %p196_p4 = pnand %p967_p13, %p966_p10 }
  0x30   : > { %s201_s26 = sand.u32 (!%p196_p4), 1, %s707_s16   ;;  %p968_p6 = scmp.ne.s32.totalorder (!%p196_p4), %s961_s24, 0 }
  0x31   : > { %199 = sbr.rel (%p196_p4) target bundleno = 281 (0x119), region = 32  ;;  %s474_s30 = sshll.u32 (!%p196_p4), %s201_s26, 3 }
  0x32   : > { %s202_s6 = scalar_lea.sflag (!%p196_p4), [#allocation3], %s201_s26  ;;  %s205_s7 = scalar_lea.vmem (!%p196_p4), [#allocation2], %s474_s30 }
  0x38   : > { %681 = dma.done.wait (%p968_p6), %s202_s6, 128  }
  0x39   : > { %683 = vsyncadd (%p968_p6), %s202_s6, 4294967168  ;;  %s479_s5 = sshll.u32 %s711_s17, 10  ;;  %v254_v0 = vlaneseq  ;;  %v276_v8 = vld [vmem:[%s205_s7] sm:$0xff]  ;;  %s722_s24 = smov 127   ;;  %v725_v12 = vmov 0.0  }
  0x3a   : > { %v259_v3 = vstv %s479_s5  ;;  %s723_s4 = smov 125   ;;  %v865_v11 = vld [vmem:[%s955_s2] ss:$0 sm:$0xff]  ;;  %s724_s10 = smov 126  }
  0x3b   : > { %v855_v1 = vshrl.u32 %v254_v0, 7  ;;  %v257_v2 = vand.u32 127, %v254_v0  ;;  %s232_s11 = sand.u32 1, %s695_s13   ;;  %p238_p12 = scmp.lt.s32.totalorder %s711_s17, 0 }
  0x3c   : > { %s873_s15 = scalar_lea.vmem [#allocation5], %s232_s11  ;;  %s481_s30 = sshll.u32 %s711_s17, 4 }
  0x3d   : > { %v258_v4 = vmul.u32 128, %v855_v1  ;;  %v267_v5 = vand.u32 3, %v257_v2  ;;  %251 = vst [vmem:[%s873_s15] sm:$0x1] %v725_v12  ;;  %s239_s20 = scalar_select %p238_p12, %s711_s17, 0  ;;  %v328_v44 = vsub.s32 0, %v855_v1 }
  0x3e   : > { %s381_s6 = sshll.u32 %s873_s15, 4  ;;  %p971_p2 = scmp.ne.s32.totalorder %s962_s28, 0  ;;  %s899_s6 = int_to_ptr.vmem [resolvable:$true] %s381_s6 }
  0x3f   : > { %v260_v6 = vadd.s32 %v259_v3, %v258_v4  ;;  %vm275_vm0 = vcmp.eq.s32.totalorder %v267_v5, 0  ;;  %s983_s20 = smov (!%p238_p12, %s239_s20), 0  ;;  %s616_s8 = scalar_lea.vmem %s899_s6, 16 }
  0x40   : > { %s478_s21 = sshll.u32 %s983_s20, 1  ;;  %p617_p0 = scmp.ne.s32.totalorder %s899_s6, %s616_s8 }
  0x41   : > { %v261_v7 = vadd.s32 %v260_v6, %v257_v2  ;;  %s243_s26 = scalar_lea.vmem %s954_s1, %s478_s21  ;;  %s726_s17 = smov [#allocation5]  }
  0x42   : > { %v278_v33 = vld [vmem:[%s243_s26] sm:$0x3]  ;;  %p618_p3 = pnand %p617_p0, %p971_p2  ;;  %s620_s9 = sshll.u32 %s726_s17, 4  ;;  %s621_s9 = int_to_ptr.vmem [resolvable:$false] %s620_s9 }
  0x43   : > { %vm262_vm1 = vcmp.lt.s32.totalorder %v261_v7, 1024  ;;  %v279_v35 = vunpack.c.0.s8 %v278_v33  ;;  %p623_p8 = scmp.lt.s32.totalorder %s899_s6, %s621_s9 }
  0x44   : > { %v277_v9 = vsel %vm262_vm1, %v276_v8, 0.0  ;;  %vm858_vm2 = vmand %vm275_vm0, %vm262_vm1  ;;  %v359_v2 = vld [vmem:[%s873_s15] sm:$0x1]  ;;  %p619_p5 = pneg %p618_p3 }
  0x45   : > { %282 = vrot.lane.b32.xlu0 %v277_v9, %s722_s24  ;;  %288 = vrot.lane.b32.xlu1 %v277_v9, %s723_s4  ;;  %vm331_vm3 = vcmp.eq.s32.totalorder %v279_v35, 2  ;;  %vm338_vm4 = vcmp.eq.s32.totalorder %v279_v35, 1  ;;  %vm345_vm5 = vcmp.eq.s32.totalorder %v279_v35, 0 }
  0x49   : > { %285 = vrot.lane.b32.xlu0 %v277_v9, %s724_s10  ;;  %299 = vrot.lane.b32.xlu1 %v865_v11, %s724_s10  ;;  %s622_s10 = scalar_lea.vmem %s621_s9, 32 }
  0x4a   : > { %p624_p11 = scmp.lt.s32.totalorder %s622_s10, %s616_s8 }
  0x4c   : > { %p625_p1 = por %p624_p11, %p623_p8 }
  0x4d   : > { %302 = vrot.lane.b32.xlu0 %v865_v11, %s723_s4  ;;  %296 = vrot.lane.b32.xlu1 %v865_v11, %s722_s24  ;;  %s897_s24 = scalar_lea.hbm %s956_s3, %s481_s30  ;;  %s369_s4 = scalar_lea.sflag [#allocation4], %s232_s11 }
  0x4e   : > { %p626_p7 = pnand %p625_p1, %p619_p5 }
  0xb7   : > { %v283_v13 = vpop.permute.xlu0 %282  ;;  %v289_v17 = vpop.permute.xlu1 %288 }
  0xb8   : > { %v305_v14 = vmax.f32 %v277_v9, %v283_v13 }
  0xbb   : > { %v286_v15 = vpop.permute.xlu0 %285  ;;  %v300_v41 = vpop.permute.xlu1 %299 }
  0xbc   : > { %v306_v16 = vmax.f32 %v305_v14, %v286_v15  ;;  %v332_v36 = vsel %vm331_vm3, %v286_v15, %v289_v17  ;;  %v336_v47 = vrot.slane %v300_v41, %v328_v44 }
  0xbd   : > { %v339_v39 = vsel %vm338_vm4, %v283_v13, %v332_v36 }
  0xbe   : > { %v307_v18 = vmax.f32 %v306_v16, %v289_v17  ;;  %v346_v42 = vsel %vm345_vm5, %v277_v9, %v339_v39 }
  0xbf   : > { %v303_v45 = vpop.permute.xlu0 %302  ;;  %v297_v49 = vpop.permute.xlu1 %296 }
  0xc0   : > { %v308_v19 = vsub.f32 %v277_v9, %v307_v18  ;;  %v311_v20 = vsub.f32 %v283_v13, %v307_v18  ;;  %v315_v21 = vsub.f32 %v286_v15, %v307_v18  ;;  %v319_v22 = vsub.f32 %v289_v17, %v307_v18 }
  0xc1   : > { %v329_v48 = vrot.slane %v303_v45, %v328_v44  ;;  %v343_v50 = vrot.slane %v297_v49, %v328_v44 }
  0xc2   : > { %v309_v23 = vmul.f32 1.442695, %v308_v19  ;;  %v312_v24 = vmul.f32 1.442695, %v311_v20  ;;  %v316_v25 = vmul.f32 1.442695, %v315_v21 }
  0xc3   : > { %v320_v26 = vmul.f32 1.442695, %v319_v22  ;;  %v337_v51 = vsel %vm331_vm3, %v336_v47, %v329_v48 }
  0xc4   : > { %574 = vpow2.f32 %v309_v23  ;;  %v344_v52 = vsel %vm338_vm4, %v343_v50, %v337_v51 }
  0xc5   : > { %576 = vpow2.f32 %v312_v24  ;;  %v348_v54 = vsel %vm345_vm5, %v865_v11, %v344_v52 }
  0xc6   : > { %578 = vpow2.f32 %v316_v25  ;;  %v352_v56 = vsub.f32 0.0, %v348_v54 }
  0xc7   : > { %580 = vpow2.f32 %v320_v26 }
  0xce   : > { %v575_v27 = vpop.eup %574 }
  0xcf   : > { %v577_v28 = vpop.eup %576 }
  0xd0   : > { %v314_v29 = vadd.f32 %v577_v28, %v575_v27  ;;  %v579_v30 = vpop.eup %578 }
  0xd1   : > { %v581_v32 = vpop.eup %580 }
  0xd2   : > { %v318_v31 = vadd.f32 %v579_v30, %v314_v29 }
  0xd4   : > { %v322_v34 = vadd.f32 %v581_v32, %v318_v31 }
  0xd6   : > { %582 = vlog2.f32 %v322_v34 }
  0xe0   : > { %v583_v37 = vpop.eup %582 }
  0xe1   : > { %v324_v38 = vmul.f32 0.6931472, %v583_v37 }
  0xe3   : > { %v325_v40 = vadd.f32 %v324_v38, %v307_v18 }
  0xe5   : > { %v349_v43 = vsub.f32 %v346_v42, %v325_v40 }
  0xe7   : > { %v350_v46 = vmul.f32 1.442695, %v349_v43 }
  0xe9   : > { %584 = vpow2.f32 %v350_v46 }
  0xf3   : > { %v585_v53 = vpop.eup %584 }
  0xf4   : > { %v353_v55 = vsub.f32 1.0, %v585_v53 }
  0xf6   : > { %v354_v57 = vmul.f32 %v353_v55, %v353_v55 }
  0xf8   : > { %v355_v58 = vmul.f32 %v354_v57, %v352_v56 }
  0xfa   : > { %v356_v59 = vmul.f32 %v355_v58, %v349_v43 }
  0xfc   : > { %v358_v60 = vsel %vm858_vm2, %v356_v59, 0.0 }
  0xfd   : > { %v360_v61 = vrot.slane %v358_v60, 4 }
  0xff   : > { %v361_v62 = vadd.f32 %v360_v61, %v358_v60 }
 0x101   : > { %v362_v63 = vrot.slane %v361_v62, 2 }
 0x103   : > { %v363_v0 = vadd.f32 %v362_v63, %v361_v62 }
 0x105   : > { %v364_v1 = vrot.slane %v363_v0, 1 }
 0x107   : > { %v365_v3 = vadd.f32 %v364_v1, %v363_v0 }
 0x109   : > { %v366_v4 = vadd.f32 %v365_v3, %v359_v2 }
 0x10b   : > { %367 = vst [vmem:[%s873_s15] sm:$0x1] %v366_v4 }
 0x10c   : > { %629 = shalt.err (!%p626_p7)
}
 0x10d   : > { %s630_s11 = scalar_lea.hbm %s897_s24, 16  ;;  %s634_s21 = scalar_lea.hbm %s956_s3, 32 }
 0x10e   : > { %p631_p9 = scmp.ne.s32.totalorder %s897_s24, %s630_s11  ;;  %p635_p4 = scmp.lt.u32.totalorder %s897_s24, %s956_s3 }
 0x10f   : > { %p636_p6 = scmp.lt.u32.totalorder %s634_s21, %s630_s11  ;;  %p638_p0 = scmp.lt.u32.totalorder %s630_s11, %s897_s24 }
 0x110   : > { %p632_p10 = pnand %p631_p9, %p971_p2 }
 0x111   : > { %p637_p12 = por %p636_p6, %p635_p4 }
 0x112   : > { %p633_p13 = pneg %p632_p10 }
 0x113   : > { %p639_p3 = por %p638_p0, %p637_p12 }
 0x115   : > { %p640_p5 = pnand %p639_p3, %p633_p13 }
 0x117   : > { %643 = shalt.err (!%p640_p5)
}
 0x118   : > { %486 = dma.vmem_to_hbm [thread:$0]  (%p971_p2), %s899_s6, 16, %s897_s24, %s369_s4  }
 0x119 PF: > { %s393_s26 = sand.u32 1, %s691_s12   ;;  %p972_p8 = scmp.ne.s32.totalorder %s963_s29, 0 }
 0x11a   : > { %p973_p11 = scmp.ge.s32.totalorder %s719_s19, 2  ;;  %s394_s30 = scalar_lea.sflag [#allocation4], %s393_s26 }
 0x11c   : > { %p493_p1 = pnand %p973_p11, %p972_p8 }
 0x11e   : > { %685 = dma.done.wait (!%p493_p1), %s394_s30, 16  }
 0x11f   : > { %687 = vsyncadd (!%p493_p1), %s394_s30, 4294967280  ;;  %s19_s19 = sadd.s32 1, %s719_s19   ;;  %s974_s12 = smov %s695_s13 }
 0x120   : > { %p16_p7 = scmp.ge.s32.totalorder %s19_s19, 4   ;;  %s975_s13 = smov %s699_s14 }
 0x121   : > { %s976_s14 = smov %s805_s27  ;;  %s977_s15 = smov %s707_s16 }
 0x122   : > { %s943_s16 = smov 0   ;;  %s978_s17 = smov %s715_s18 }
 0x123   : > { %s979_s18 = smov %s981_s22  ;;  %18 = sbr.rel (!%p16_p7) target bundleno = 7 (0x7), region = 84 }
 0x12a   :  { %398 = vsyncpa [#allocation3], 1 }
 0x12b   :  { %400 = vsyncpa [#allocation3 + $0x1], 1 }
 0x12c   :  { %401 = vsyncpa [#allocation4], 1 }
 0x12d   :  { %403 = vsyncpa [#allocation4 + $0x1], 1 }

</bundles_post_ra>
